<compile_context>
chip_gen: v5e
topology: v5e:2x2
jax: 0.10.0
libtpu: 0.0.40
codegen_flags: <defaults>
</compile_context>

<pallas_src>
import functools

import jax
import jax.numpy as jnp
from jax import lax
from jax.experimental import pallas as pl
from jax.experimental.pallas import tpu as pltpu


def _closs_local_v2_kernel(m_ref, e_ref, den_ref, x_ref, out_ref, feat_acc,
                           *, ts, band):
    """One grid step: batch b, band k of `ts` nearest-neighbour source rows.

    m_ref    : (1, 1, ts, R, w)   binarised small-mask rows (f32)
    e_ref    : (w, band)          one-hot pooling matrix (input dtype)
    den_ref  : (1, R, 1)          precomputed upsampled-mask area + eps (f32)
    x_ref    : (1, C, ts * band)  input chunk, native dtype
    out_ref  : (1, 1, 1)          per-batch sum of squared differences
    feat_acc : (R, C) f32         masked-sum accumulator (VMEM scratch)
    """
    k = pl.program_id(1)

    @pl.when(k == 0)
    def _():
        feat_acc[...] = jnp.zeros_like(feat_acc)

    e = e_ref[...]                                                   # (w, band)

    def row_step(t, acc):
        # Contiguous lane window holding this source row's high-res footprint.
        xt = x_ref[0, :, pl.ds(t * band, band)]                      # (C, band)
        # Pooling on the MXU (K = band lanes), f32 accumulation.
        pooled = lax.dot_general(e, xt, (((1,), (1,)), ((), ())),
                                 preferred_element_type=jnp.float32)  # (w, C)
        # Tiny (R, w) x (w, C) contraction against the mask row.
        mt = m_ref[0, 0, t]                                          # (R, w)
        return acc + jnp.dot(mt, pooled, preferred_element_type=jnp.float32)

    acc = feat_acc[...]
    # ts is static and bounded by the tile chooser, so a plain unrolled loop
    # keeps everything visible to the LLO scheduler.
    for t in range(ts):
        acc = row_step(t, acc)
    feat_acc[...] = acc

    @pl.when(k == pl.num_programs(1) - 1)
    def _():
        feat = acc / den_ref[0]                                      # (R, C)
        diff = feat[:-1, :] - feat[-1:, :]                           # (R-1, C)
        out_ref[...] = jnp.sum(diff * diff)[None, None, None]


def _vmem_capacity_bytes():
    """Physical VMEM per core; conservative 64 MiB (v7x) if undeterminable."""
    try:
        cap = getattr(pltpu.get_tpu_info(), "vmem_capacity_bytes", None)
        if cap:
            return int(cap)
    except Exception:
        pass
    return 64 << 20


def _pad(n, to):
    return -(-n // to) * to


def _choose_band_rows(h_eff, band, C, x_item, R, w, budget):
    """Source rows per chunk (ts).  Constraints: ts | h_eff and the chunk lane
    count ts*band is 128-aligned (or the full extent).  Sized for ~7 MiB x
    chunks under a padding-aware, generation-aware VMEM budget."""

    def est(ts):
        x_b = 2 * _pad(C, 8) * _pad(ts * band, 128) * x_item     # dbl-buffered x
        m_b = 2 * ts * _pad(R, 8) * 128 * 4                      # mask band tiles
        e_b = 2 * _pad(w, 8) * _pad(band, 128) * x_item          # e_band (constant)
        d_b = 2 * _pad(R, 8) * 128 * 4                           # den
        acc_b = _pad(R, 8) * _pad(C, 128) * 4                    # feat_acc scratch
        return x_b + m_b + e_b + d_b + acc_b + (2 << 20)         # Mosaic headroom

    cands = sorted(t for t in range(1, h_eff + 1)
                   if h_eff % t == 0 and ((t * band) % 128 == 0 or t == h_eff))
    target_x = 7 << 20        # per-buffer x-chunk target (review: 6-8 MiB)
    max_unroll = 64           # bound the in-kernel static row loop

    best = cands[0]
    for t in cands:
        if est(t) > budget and t != cands[0]:
            break
        best = t
        if C * t * band * x_item >= target_x or t >= max_unroll:
            break
    # TODO(synk): if even the smallest band exceeds the budget (huge C*W), add a
    # channel-split grid axis instead of just raising the vmem limit.
    return best, est(best)


def closs_local_v2(input_in, mask_local):
    """input_in: (B, C, H, W) float; mask_local: (B, R, h, w) float."""
    B, C, H, W = input_in.shape
    _, R, h_in, w_in = mask_local.shape

    if R < 2:
        # Reference MSE over an empty tensor is undefined (NaN); guard it.
        return jnp.zeros((), jnp.float32)

    if not jnp.issubdtype(input_in.dtype, jnp.floating):
        input_in = input_in.astype(jnp.float32)
    x_item = input_in.dtype.itemsize

    # ---- tiny (O(B*R*h*w)) wrapper prep; `input_in` is only reshaped (a
    # layout no-op on contiguous trailing dims) — never cast/gathered/copied. --
    if H % h_in == 0:
        # Uniform nearest-neighbour row bands of height sh.
        h_eff, sh = h_in, H // h_in
        m_rows = mask_local.astype(jnp.float32)                    # (B, R, h, w)
    else:
        # Non-uniform row replication: gather mask rows to full H (still only
        # B*R*H*w elements, never the full (H, W) mask).
        src_h = (jnp.arange(H) * h_in) // H
        h_eff, sh = H, 1
        m_rows = mask_local.astype(jnp.float32)[:, :, src_h, :]    # (B, R, H, w)

    band = sh * W                       # high-res lanes per source row

    # One-hot column-pooling matrix (nearest along W), tiled over the sh
    # identical rows of a band.  Tiny, stored in the input dtype (exact).
    src_w = (jnp.arange(W) * w_in) // W
    e_w = (src_w[None, :] == jnp.arange(w_in)[:, None])            # (w, W) bool
    cnt_w = jnp.sum(e_w, axis=1).astype(jnp.float32)               # (w,)
    e_band = jnp.tile(e_w, (1, sh)).astype(input_in.dtype)         # (w, band)

    # Binarise once (hoisted out of the per-chunk path).  Kept in f32 so any
    # untouched non-positive mask values are not rounded (review concern).
    m_bin = jnp.where(m_rows > 0, jnp.float32(1), m_rows)          # (B, R, h_eff, w)

    # Denominator (upsampled-mask area) fully hoisted to a tiny XLA einsum.
    den = (sh * jnp.einsum('brij,j->br', m_bin, cnt_w)
           + jnp.float32(1e-10)).reshape(B, R, 1)

    # ---- tiling ----
    budget = (_vmem_capacity_bytes() * 3) // 4    # ~48 MiB v7x, ~96 MiB v5e/v6e
    ts, vmem_est = _choose_band_rows(h_eff, band, C, x_item, R, w_in, budget)
    nk = h_eff // ts

    # Mask rearranged so each grid step reads a (ts, R, w) tile; (R, w) are the
    # tiled dims so per-row slices are layout-clean.
    m_arr = m_bin.reshape(B, R, nk, ts, w_in).transpose(0, 2, 3, 1, 4)  # (B,nk,ts,R,w)

    x_flat = input_in.reshape(B, C, H * W)                          # native dtype

    kernel = functools.partial(_closs_local_v2_kernel, ts=ts, band=band)

    compiler_params = pltpu.CompilerParams(
        dimension_semantics=("parallel", "arbitrary"),
        vmem_limit_bytes=int(min(budget, max(32 << 20, 2 * vmem_est))),
    )
    cost = pl.CostEstimate(
        flops=int(2 * B * C * H * W * w_in + 2 * B * h_eff * R * w_in * C),
        transcendentals=0,
        bytes_accessed=int(B * C * H * W * x_item + m_arr.size * 4
                           + e_band.size * x_item + den.size * 4 + B * 4),
    )

    # TODO(synk): on v7x with B == 1 (or odd B) add a second 'parallel' split
    # over C so both TensorCores stay busy; with even B the batch axis suffices.
    partial_sq = pl.pallas_call(
        kernel,
        out_shape=jax.ShapeDtypeStruct((B, 1, 1), jnp.float32),
        grid_spec=pltpu.PrefetchScalarGridSpec(
            num_scalar_prefetch=0,
            grid=(B, nk),
            in_specs=[
                pl.BlockSpec((1, 1, ts, R, w_in), lambda b, k: (b, k, 0, 0, 0)),
                # e_band / den have constant-in-k index maps -> fetched once and
                # resident; both are tiny so default double buffering costs
                # nothing (no need for pl.Buffered(1)).  A Buffered(3) sweep on
                # the x spec is left for trace-driven tuning.
                pl.BlockSpec((w_in, band), lambda b, k: (0, 0)),
                pl.BlockSpec((1, R, 1), lambda b, k: (b, 0, 0)),
                pl.BlockSpec((1, C, ts * band), lambda b, k: (b, 0, k)),
            ],
            out_specs=pl.BlockSpec((1, 1, 1), lambda b, k: (b, 0, 0)),
            scratch_shapes=[pltpu.VMEM((R, C), jnp.float32)],
        ),
        compiler_params=compiler_params,
        cost_estimate=cost,
    )(m_arr, e_band, den, x_flat)

    # Final tiny reduction: MSE mean over (B, R-1, C) elements.
    return jnp.sum(partial_sq) / (B * (R - 1) * C)


def _reference(input_in, mask_local):
    B, C, H, W = input_in.shape
    _, R, h_in, w_in = mask_local.shape
    src_h = (jnp.arange(H) * h_in) // H
    src_w = (jnp.arange(W) * w_in) // W
    m = mask_local[:, :, src_h][:, :, :, src_w]
    m = jnp.where(m > 0, 1.0, m)
    local_feats = m[:, :, None] * input_in[:, None]                  # (B,R,C,H,W)
    feat = jnp.sum(local_feats, axis=(3, 4)) / (
        jnp.sum(m, axis=(2, 3))[:, :, None] + 1e-10
    )                                                                # (B,R,C)
    return jnp.mean((feat[:, :-1] - feat[:, -1:]) ** 2)


if __name__ == "__main__":
    key = jax.random.PRNGKey(0)
    k1, k2 = jax.random.split(key)

    B, C, H, W = 2, 4, 16, 16
    R, h_in, w_in = 4, 8, 8

    input_in = jax.random.normal(k1, (B, C, H, W), dtype=jnp.float32)
    raw = jax.random.uniform(k2, (B, R, h_in, w_in), dtype=jnp.float32)
    # mixed zeros and positive (non-binary) values to exercise the binarize step
    mask_local = jnp.where(raw > 0.4, raw, 0.0)

    loss = jax.jit(closs_local_v2)(input_in, mask_local)
    jax.block_until_ready(loss)

    ref = _reference(input_in, mask_local)
    assert jnp.allclose(loss, ref, rtol=1e-5, atol=1e-6), (loss, ref)

    print("KERNEL_OK")
</pallas_src>

<mosaic_0001>
module attributes {stable_mosaic.version = 11 : i64} {
  func.func @_closs_local_v2_kernel(%arg0: i32, %arg1: i32, %arg2: memref<1x1x8x4x8xf32, #tpu.memory_space<vmem>>, %arg3: memref<8x32xf32, #tpu.memory_space<vmem>>, %arg4: memref<1x4x1xf32, #tpu.memory_space<vmem>>, %arg5: memref<1x4x256xf32, #tpu.memory_space<vmem>>, %arg6: memref<1x1x1xf32, #tpu.memory_space<vmem>>, %arg7: memref<4x4xf32, #tpu.memory_space<vmem>>) attributes {dimension_semantics = [#tpu.dimension_semantics<parallel>, #tpu.dimension_semantics<arbitrary>], iteration_bounds = array<i64: 2, 1>, scalar_prefetch = 0 : i64, scratch_operands = 1 : i64, tpu.core_type = #tpu.core_type<tc>, window_params = [{transform_indices = @transform_0, window_bounds = array<i64: 1, 1, 8, 4, 8>}, {pipeline_mode = #tpu.pipeline_mode<synchronous>, transform_indices = @transform_1, window_bounds = array<i64: 8, 32>}, {transform_indices = @transform_2, window_bounds = array<i64: 1, 4, 1>}, {transform_indices = @transform_3, window_bounds = array<i64: 1, 4, 256>}, {transform_indices = @transform_4, window_bounds = array<i64: 1, 1, 1>}]} {
    %c0_i32 = arith.constant 0 : i32
    %0 = arith.cmpi eq, %arg1, %c0_i32 : i32
    %1 = arith.extui %0 : i1 to i32
    %c0_i32_0 = arith.constant 0 : i32
    %2 = arith.cmpi ne, %1, %c0_i32_0 : i32
    scf.if %2 {
      %cst_73 = arith.constant 0.000000e+00 : f32
      %65 = vector.broadcast %cst_73 : f32 to vector<4x4xf32>
      %c0_74 = arith.constant 0 : index
      %c0_75 = arith.constant 0 : index
      %66 = vector.load %arg7[%c0_74, %c0_75] : memref<4x4xf32, #tpu.memory_space<vmem>>, vector<4x4xf32>
      tpu.vector_store %arg7[%c0_74, %c0_75], %65 {strides = array<i32>} : memref<4x4xf32, #tpu.memory_space<vmem>>, vector<4x4xf32>,
    } else {
    }
    %c0 = arith.constant 0 : index
    %c0_1 = arith.constant 0 : index
    %3 = vector.load %arg3[%c0, %c0_1] : memref<8x32xf32, #tpu.memory_space<vmem>>, vector<8x32xf32>
    %c0_2 = arith.constant 0 : index
    %c0_3 = arith.constant 0 : index
    %4 = vector.load %arg7[%c0_2, %c0_3] : memref<4x4xf32, #tpu.memory_space<vmem>>, vector<4x4xf32>
    %c0_4 = arith.constant 0 : index
    %c0_5 = arith.constant 0 : index
    %c0_6 = arith.constant 0 : index
    %5 = vector.load %arg5[%c0_4, %c0_5, %c0_6] : memref<1x4x256xf32, #tpu.memory_space<vmem>>, vector<1x4x32xf32>
    %6 = vector.shape_cast %5 : vector<1x4x32xf32> to vector<4x32xf32>
    %cst = arith.constant dense<0.000000e+00> : vector<8x4xf32>
    %7 = tpu.matmul %3, %6, %cst {dimension_numbers = #tpu.dot_dimension_numbers<[1], [1], [0], [0], [0, 0, 1, 0], [], []>} : vector<8x32xf32>, vector<4x32xf32>, vector<8x4xf32> -> vector<8x4xf32>
    %c0_7 = arith.constant 0 : index
    %c0_8 = arith.constant 0 : index
    %c0_9 = arith.constant 0 : index
    %c0_10 = arith.constant 0 : index
    %c0_11 = arith.constant 0 : index
    %8 = vector.load %arg2[%c0_7, %c0_8, %c0_9, %c0_10, %c0_11] : memref<1x1x8x4x8xf32, #tpu.memory_space<vmem>>, vector<1x1x1x4x8xf32>
    %9 = vector.shape_cast %8 : vector<1x1x1x4x8xf32> to vector<4x8xf32>
    %cst_12 = arith.constant dense<0.000000e+00> : vector<4x4xf32>
    %10 = tpu.matmul %9, %7, %cst_12 {dimension_numbers = #tpu.dot_dimension_numbers<[1], [0], [0], [1], [0, 0, 1, 1], [], []>} : vector<4x8xf32>, vector<8x4xf32>, vector<4x4xf32> -> vector<4x4xf32>
    %11 = arith.addf %4, %10 : vector<4x4xf32>
    %c0_13 = arith.constant 0 : index
    %c0_14 = arith.constant 0 : index
    %c32 = arith.constant 32 : index
    %12 = vector.load %arg5[%c0_13, %c0_14, %c32] : memref<1x4x256xf32, #tpu.memory_space<vmem>>, vector<1x4x32xf32>
    %13 = vector.shape_cast %12 : vector<1x4x32xf32> to vector<4x32xf32>
    %cst_15 = arith.constant dense<0.000000e+00> : vector<8x4xf32>
    %14 = tpu.matmul %3, %13, %cst_15 {dimension_numbers = #tpu.dot_dimension_numbers<[1], [1], [0], [0], [0, 0, 1, 0], [], []>} : vector<8x32xf32>, vector<4x32xf32>, vector<8x4xf32> -> vector<8x4xf32>
    %c0_16 = arith.constant 0 : index
    %c0_17 = arith.constant 0 : index
    %c1 = arith.constant 1 : index
    %c0_18 = arith.constant 0 : index
    %c0_19 = arith.constant 0 : index
    %15 = vector.load %arg2[%c0_16, %c0_17, %c1, %c0_18, %c0_19] : memref<1x1x8x4x8xf32, #tpu.memory_space<vmem>>, vector<1x1x1x4x8xf32>
    %16 = vector.shape_cast %15 : vector<1x1x1x4x8xf32> to vector<4x8xf32>
    %cst_20 = arith.constant dense<0.000000e+00> : vector<4x4xf32>
    %17 = tpu.matmul %16, %14, %cst_20 {dimension_numbers = #tpu.dot_dimension_numbers<[1], [0], [0], [1], [0, 0, 1, 1], [], []>} : vector<4x8xf32>, vector<8x4xf32>, vector<4x4xf32> -> vector<4x4xf32>
    %18 = arith.addf %11, %17 : vector<4x4xf32>
    %c0_21 = arith.constant 0 : index
    %c0_22 = arith.constant 0 : index
    %c64 = arith.constant 64 : index
    %19 = vector.load %arg5[%c0_21, %c0_22, %c64] : memref<1x4x256xf32, #tpu.memory_space<vmem>>, vector<1x4x32xf32>
    %20 = vector.shape_cast %19 : vector<1x4x32xf32> to vector<4x32xf32>
    %cst_23 = arith.constant dense<0.000000e+00> : vector<8x4xf32>
    %21 = tpu.matmul %3, %20, %cst_23 {dimension_numbers = #tpu.dot_dimension_numbers<[1], [1], [0], [0], [0, 0, 1, 0], [], []>} : vector<8x32xf32>, vector<4x32xf32>, vector<8x4xf32> -> vector<8x4xf32>
    %c0_24 = arith.constant 0 : index
    %c0_25 = arith.constant 0 : index
    %c2 = arith.constant 2 : index
    %c0_26 = arith.constant 0 : index
    %c0_27 = arith.constant 0 : index
    %22 = vector.load %arg2[%c0_24, %c0_25, %c2, %c0_26, %c0_27] : memref<1x1x8x4x8xf32, #tpu.memory_space<vmem>>, vector<1x1x1x4x8xf32>
    %23 = vector.shape_cast %22 : vector<1x1x1x4x8xf32> to vector<4x8xf32>
    %cst_28 = arith.constant dense<0.000000e+00> : vector<4x4xf32>
    %24 = tpu.matmul %23, %21, %cst_28 {dimension_numbers = #tpu.dot_dimension_numbers<[1], [0], [0], [1], [0, 0, 1, 1], [], []>} : vector<4x8xf32>, vector<8x4xf32>, vector<4x4xf32> -> vector<4x4xf32>
    %25 = arith.addf %18, %24 : vector<4x4xf32>
    %c0_29 = arith.constant 0 : index
    %c0_30 = arith.constant 0 : index
    %c96 = arith.constant 96 : index
    %26 = vector.load %arg5[%c0_29, %c0_30, %c96] : memref<1x4x256xf32, #tpu.memory_space<vmem>>, vector<1x4x32xf32>
    %27 = vector.shape_cast %26 : vector<1x4x32xf32> to vector<4x32xf32>
    %cst_31 = arith.constant dense<0.000000e+00> : vector<8x4xf32>
    %28 = tpu.matmul %3, %27, %cst_31 {dimension_numbers = #tpu.dot_dimension_numbers<[1], [1], [0], [0], [0, 0, 1, 0], [], []>} : vector<8x32xf32>, vector<4x32xf32>, vector<8x4xf32> -> vector<8x4xf32>
    %c0_32 = arith.constant 0 : index
    %c0_33 = arith.constant 0 : index
    %c3 = arith.constant 3 : index
    %c0_34 = arith.constant 0 : index
    %c0_35 = arith.constant 0 : index
    %29 = vector.load %arg2[%c0_32, %c0_33, %c3, %c0_34, %c0_35] : memref<1x1x8x4x8xf32, #tpu.memory_space<vmem>>, vector<1x1x1x4x8xf32>
    %30 = vector.shape_cast %29 : vector<1x1x1x4x8xf32> to vector<4x8xf32>
    %cst_36 = arith.constant dense<0.000000e+00> : vector<4x4xf32>
    %31 = tpu.matmul %30, %28, %cst_36 {dimension_numbers = #tpu.dot_dimension_numbers<[1], [0], [0], [1], [0, 0, 1, 1], [], []>} : vector<4x8xf32>, vector<8x4xf32>, vector<4x4xf32> -> vector<4x4xf32>
    %32 = arith.addf %25, %31 : vector<4x4xf32>
    %c0_37 = arith.constant 0 : index
    %c0_38 = arith.constant 0 : index
    %c128 = arith.constant 128 : index
    %33 = vector.load %arg5[%c0_37, %c0_38, %c128] : memref<1x4x256xf32, #tpu.memory_space<vmem>>, vector<1x4x32xf32>
    %34 = vector.shape_cast %33 : vector<1x4x32xf32> to vector<4x32xf32>
    %cst_39 = arith.constant dense<0.000000e+00> : vector<8x4xf32>
    %35 = tpu.matmul %3, %34, %cst_39 {dimension_numbers = #tpu.dot_dimension_numbers<[1], [1], [0], [0], [0, 0, 1, 0], [], []>} : vector<8x32xf32>, vector<4x32xf32>, vector<8x4xf32> -> vector<8x4xf32>
    %c0_40 = arith.constant 0 : index
    %c0_41 = arith.constant 0 : index
    %c4 = arith.constant 4 : index
    %c0_42 = arith.constant 0 : index
    %c0_43 = arith.constant 0 : index
    %36 = vector.load %arg2[%c0_40, %c0_41, %c4, %c0_42, %c0_43] : memref<1x1x8x4x8xf32, #tpu.memory_space<vmem>>, vector<1x1x1x4x8xf32>
    %37 = vector.shape_cast %36 : vector<1x1x1x4x8xf32> to vector<4x8xf32>
    %cst_44 = arith.constant dense<0.000000e+00> : vector<4x4xf32>
    %38 = tpu.matmul %37, %35, %cst_44 {dimension_numbers = #tpu.dot_dimension_numbers<[1], [0], [0], [1], [0, 0, 1, 1], [], []>} : vector<4x8xf32>, vector<8x4xf32>, vector<4x4xf32> -> vector<4x4xf32>
    %39 = arith.addf %32, %38 : vector<4x4xf32>
    %c0_45 = arith.constant 0 : index
    %c0_46 = arith.constant 0 : index
    %c160 = arith.constant 160 : index
    %40 = vector.load %arg5[%c0_45, %c0_46, %c160] : memref<1x4x256xf32, #tpu.memory_space<vmem>>, vector<1x4x32xf32>
    %41 = vector.shape_cast %40 : vector<1x4x32xf32> to vector<4x32xf32>
    %cst_47 = arith.constant dense<0.000000e+00> : vector<8x4xf32>
    %42 = tpu.matmul %3, %41, %cst_47 {dimension_numbers = #tpu.dot_dimension_numbers<[1], [1], [0], [0], [0, 0, 1, 0], [], []>} : vector<8x32xf32>, vector<4x32xf32>, vector<8x4xf32> -> vector<8x4xf32>
    %c0_48 = arith.constant 0 : index
    %c0_49 = arith.constant 0 : index
    %c5 = arith.constant 5 : index
    %c0_50 = arith.constant 0 : index
    %c0_51 = arith.constant 0 : index
    %43 = vector.load %arg2[%c0_48, %c0_49, %c5, %c0_50, %c0_51] : memref<1x1x8x4x8xf32, #tpu.memory_space<vmem>>, vector<1x1x1x4x8xf32>
    %44 = vector.shape_cast %43 : vector<1x1x1x4x8xf32> to vector<4x8xf32>
    %cst_52 = arith.constant dense<0.000000e+00> : vector<4x4xf32>
    %45 = tpu.matmul %44, %42, %cst_52 {dimension_numbers = #tpu.dot_dimension_numbers<[1], [0], [0], [1], [0, 0, 1, 1], [], []>} : vector<4x8xf32>, vector<8x4xf32>, vector<4x4xf32> -> vector<4x4xf32>
    %46 = arith.addf %39, %45 : vector<4x4xf32>
    %c0_53 = arith.constant 0 : index
    %c0_54 = arith.constant 0 : index
    %c192 = arith.constant 192 : index
    %47 = vector.load %arg5[%c0_53, %c0_54, %c192] : memref<1x4x256xf32, #tpu.memory_space<vmem>>, vector<1x4x32xf32>
    %48 = vector.shape_cast %47 : vector<1x4x32xf32> to vector<4x32xf32>
    %cst_55 = arith.constant dense<0.000000e+00> : vector<8x4xf32>
    %49 = tpu.matmul %3, %48, %cst_55 {dimension_numbers = #tpu.dot_dimension_numbers<[1], [1], [0], [0], [0, 0, 1, 0], [], []>} : vector<8x32xf32>, vector<4x32xf32>, vector<8x4xf32> -> vector<8x4xf32>
    %c0_56 = arith.constant 0 : index
    %c0_57 = arith.constant 0 : index
    %c6 = arith.constant 6 : index
    %c0_58 = arith.constant 0 : index
    %c0_59 = arith.constant 0 : index
    %50 = vector.load %arg2[%c0_56, %c0_57, %c6, %c0_58, %c0_59] : memref<1x1x8x4x8xf32, #tpu.memory_space<vmem>>, vector<1x1x1x4x8xf32>
    %51 = vector.shape_cast %50 : vector<1x1x1x4x8xf32> to vector<4x8xf32>
    %cst_60 = arith.constant dense<0.000000e+00> : vector<4x4xf32>
    %52 = tpu.matmul %51, %49, %cst_60 {dimension_numbers = #tpu.dot_dimension_numbers<[1], [0], [0], [1], [0, 0, 1, 1], [], []>} : vector<4x8xf32>, vector<8x4xf32>, vector<4x4xf32> -> vector<4x4xf32>
    %53 = arith.addf %46, %52 : vector<4x4xf32>
    %c0_61 = arith.constant 0 : index
    %c0_62 = arith.constant 0 : index
    %c224 = arith.constant 224 : index
    %54 = vector.load %arg5[%c0_61, %c0_62, %c224] : memref<1x4x256xf32, #tpu.memory_space<vmem>>, vector<1x4x32xf32>
    %55 = vector.shape_cast %54 : vector<1x4x32xf32> to vector<4x32xf32>
    %cst_63 = arith.constant dense<0.000000e+00> : vector<8x4xf32>
    %56 = tpu.matmul %3, %55, %cst_63 {dimension_numbers = #tpu.dot_dimension_numbers<[1], [1], [0], [0], [0, 0, 1, 0], [], []>} : vector<8x32xf32>, vector<4x32xf32>, vector<8x4xf32> -> vector<8x4xf32>
    %c0_64 = arith.constant 0 : index
    %c0_65 = arith.constant 0 : index
    %c7 = arith.constant 7 : index
    %c0_66 = arith.constant 0 : index
    %c0_67 = arith.constant 0 : index
    %57 = vector.load %arg2[%c0_64, %c0_65, %c7, %c0_66, %c0_67] : memref<1x1x8x4x8xf32, #tpu.memory_space<vmem>>, vector<1x1x1x4x8xf32>
    %58 = vector.shape_cast %57 : vector<1x1x1x4x8xf32> to vector<4x8xf32>
    %cst_68 = arith.constant dense<0.000000e+00> : vector<4x4xf32>
    %59 = tpu.matmul %58, %56, %cst_68 {dimension_numbers = #tpu.dot_dimension_numbers<[1], [0], [0], [1], [0, 0, 1, 1], [], []>} : vector<4x8xf32>, vector<8x4xf32>, vector<4x4xf32> -> vector<4x4xf32>
    %60 = arith.addf %53, %59 : vector<4x4xf32>
    %c0_69 = arith.constant 0 : index
    %c0_70 = arith.constant 0 : index
    %61 = vector.load %arg7[%c0_69, %c0_70] : memref<4x4xf32, #tpu.memory_space<vmem>>, vector<4x4xf32>
    tpu.vector_store %arg7[%c0_69, %c0_70], %60 {strides = array<i32>} : memref<4x4xf32, #tpu.memory_space<vmem>>, vector<4x4xf32>,
    %c0_i32_71 = arith.constant 0 : i32
    %62 = arith.cmpi eq, %arg1, %c0_i32_71 : i32
    %63 = arith.extui %62 : i1 to i32
    %c0_i32_72 = arith.constant 0 : i32
    %64 = arith.cmpi ne, %63, %c0_i32_72 : i32
    scf.if %64 {
      %c0_73 = arith.constant 0 : index
      %c0_74 = arith.constant 0 : index
      %c0_75 = arith.constant 0 : index
      %65 = vector.load %arg4[%c0_73, %c0_74, %c0_75] : memref<1x4x1xf32, #tpu.memory_space<vmem>>, vector<1x4x1xf32>
      %66 = vector.shape_cast %65 : vector<1x4x1xf32> to vector<4x1xf32>
      %67 = vector.broadcast %66 : vector<4x1xf32> to vector<4x4xf32>
      %68 = arith.divf %60, %67 : vector<4x4xf32>
      %69 = vector.extract_strided_slice %68 {offsets = [0, 0], sizes = [3, 4], strides = [1, 1]} : vector<4x4xf32> to vector<3x4xf32>
      %70 = vector.extract_strided_slice %68 {offsets = [3, 0], sizes = [1, 4], strides = [1, 1]} : vector<4x4xf32> to vector<1x4xf32>
      %71 = vector.broadcast %70 : vector<1x4xf32> to vector<3x4xf32>
      %72 = arith.subf %69, %71 : vector<3x4xf32>
      %73 = arith.mulf %72, %72 : vector<3x4xf32>
      %74 = vector.shape_cast %73 : vector<3x4xf32> to vector<1x3x4xf32>
      %cst_76 = arith.constant dense<0.000000e+00> : vector<1xf32>
      %75 = vector.multi_reduction <add>, %74, %cst_76 [1, 2] : vector<1x3x4xf32> to vector<1xf32>
      %76 = vector.shape_cast %75 : vector<1xf32> to vector<1x1x1xf32>
      %77 = vector.extract %76[0, 0, 0] : f32 from vector<1x1x1xf32>
      %78 = vector.broadcast %77 : f32 to vector<1x1x1xf32>
      %c0_77 = arith.constant 0 : index
      %c0_78 = arith.constant 0 : index
      %c0_79 = arith.constant 0 : index
      %79 = vector.load %arg6[%c0_77, %c0_78, %c0_79] : memref<1x1x1xf32, #tpu.memory_space<vmem>>, vector<1x1x1xf32>
      tpu.vector_store %arg6[%c0_77, %c0_78, %c0_79], %78 {strides = array<i32>} : memref<1x1x1xf32, #tpu.memory_space<vmem>>, vector<1x1x1xf32>,
    } else {
    }
    return
  }
  func.func @transform_0(%arg0: i32, %arg1: i32) -> (i32, i32, i32, i32, i32) {
    %c0_i32 = arith.constant 0 : i32
    %c0_i32_0 = arith.constant 0 : i32
    %c0_i32_1 = arith.constant 0 : i32
    %c0_i32_2 = arith.constant 0 : i32
    return %arg0, %arg1, %c0_i32, %c0_i32_0, %c0_i32_1 : i32, i32, i32, i32, i32
  }
  func.func @transform_1(%arg0: i32, %arg1: i32) -> (i32, i32) {
    %c0_i32 = arith.constant 0 : i32
    %c0_i32_0 = arith.constant 0 : i32
    %c0_i32_1 = arith.constant 0 : i32
    return %c0_i32, %c0_i32_0 : i32, i32
  }
  func.func @transform_2(%arg0: i32, %arg1: i32) -> (i32, i32, i32) {
    %c0_i32 = arith.constant 0 : i32
    %c0_i32_0 = arith.constant 0 : i32
    %c0_i32_1 = arith.constant 0 : i32
    return %arg0, %c0_i32, %c0_i32_0 : i32, i32, i32
  }
  func.func @transform_3(%arg0: i32, %arg1: i32) -> (i32, i32, i32) {
    %c0_i32 = arith.constant 0 : i32
    %c0_i32_0 = arith.constant 0 : i32
    return %arg0, %c0_i32, %arg1 : i32, i32, i32
  }
  func.func @transform_4(%arg0: i32, %arg1: i32) -> (i32, i32, i32) {
    %c0_i32 = arith.constant 0 : i32
    %c0_i32_0 = arith.constant 0 : i32
    %c0_i32_1 = arith.constant 0 : i32
    return %arg0, %c0_i32, %c0_i32_0 : i32, i32, i32
  }
}

</mosaic_0001>

<bundles_post_ra>
// kernel: closs_local_v2.1
= control target key start
LH: loop header
LB: loop body
LE: loop exit
PB: predicated region body
PF: predicated region fallthrough
CT: control target
= control target key end

     0   :  { %s975_s15 = smov 0   ;;  %s977_s16 = smov 0   ;;  %s1059_s0 = inlined_call_operand.vmem [shape: f32[2,1,8,4,8], index: 0, kind: input, shape index: {}]   ;;  %s1060_s1 = inlined_call_operand.vmem [shape: f32[8,32], index: 1, kind: input, shape index: {}]   ;;  %s1061_s2 = inlined_call_operand.vmem [shape: f32[2,4,1], index: 2, kind: input, shape index: {}]   ;;  %s1062_s3 = inlined_call_operand.vmem [shape: f32[2,4,256], index: 3, kind: input, shape index: {}]   ;;  %s1063_s4 = inlined_call_operand.vmem [shape: f32[2,1,1], index: 4, kind: output, shape index: {}]  }
   0x1   :  { %s979_s17 = smov 0  }
   0x2 LB: > { %s26_s18 = sadd.s32 1, %s939_s16  ;;  %p846_p0 = scmp.ge.s32.totalorder %s943_s17, 1  ;;  %s943_s17 = sphi %s979_s17, %s14_s17   ;;  %s939_s16 = sphi %s977_s16, %s1065_s16   ;;  %s935_s15 = sphi %s975_s15, %s1064_s15  }
   0x3   : > { %p28_p1 = scmp.ge.s32.totalorder %s26_s18, 2  ;;  %p206_p2 = scmp.lt.s32.totalorder %s943_s17, 3 }
   0x5   : > { %s1067_s18 = smov (%p28_p1, %s26_s18), 0  ;;  %p207_p3 = pnand %p846_p0, %p206_p2 }
   0x6   : > { %p247_p4 = scmp.lt.s32.totalorder (!%p207_p3), %s935_s15, 1  ;;  %s945_s25 = smov (!%p207_p3), 96  }
   0x7   : > { %210 = sbr.rel (%p207_p3) target bundleno = 624 (0x270), region = 36  ;;  %s946_s26 = smov (!%p207_p3), 64  }
   0x8   : > { %s947_s27 = smov (!%p207_p3), 32  }
   0xc   : > { %s1069_s15 = smov (!%p247_p4, %s935_s15), 1  ;;  %vm282_vm0 = vcmask 261120   ;;  %v279_v1 = vld [vmem:[%s1060_s1] sm:$0xff]  ;;  %vm277_vm1 = vcmask 27648   ;;  %vm310_vm2 = vcmask 64512   ;;  %v948_v15 = vmov 0.0  }
   0xd   : > { %s886_s19 = sshll.u32 %s1069_s15, 3  ;;  %s885_s28 = sshll.u32 %s1069_s15, 5  ;;  %278 = vst.msk [vmem:[#allocation2] sm:$0xf] %vm277_vm1, %v948_v15  ;;  %v949_v22 = vmov 0   ;;  %vm734_vm7 = vcmask 26624  }
   0xe   : > { %s268_s22 = scalar_lea.vmem %s1062_s3, %s886_s19  ;;  %s1009_s5 = scalar_lea.vmem %s1059_s0, %s885_s28  ;;  %918 = vset.pattern.permute.xlu0 %v949_v22  ;;  %vm746_vm8 = vcmask 0  }
   0xf   : > { %v281_v0 = vld [vmem:[%s268_s22] sm:$0xf]  ;;  %v495_v6 = vld [vmem:[%s268_s22 + $0x4] sm:$0xf]  ;;  %s849_s6 = sshll.u32 %s1069_s15, 2  ;;  %s272_s12 = scalar_lea.vmem %s1063_s4, %s1069_s15 }
  0x10   : > { %852 = vmatpush.xpose.msk.msra.mxu0 %vm282_vm0, %v281_v0  ;;  %335 = vst [vmem:[#allocation1] ss:$2 sm:$0xff] %v281_v0  ;;  %v387_v2 = vld [vmem:[%s268_s22] sm:$0xf]  ;;  %v597_v8 = vld [vmem:[%s268_s22 + $0x4] sm:$0xf]  ;;  %s259_s9 = scalar_lea.vmem %s1061_s2, %s849_s6 }
  0x11   : > { %v441_v4 = vld [vmem:[%s268_s22] sm:$0xf]  ;;  %v651_v10 = vld [vmem:[%s268_s22 + $0x4] sm:$0xf]  ;;  %v861_v28 = vld [vmem:[%s1009_s5 + $0x8] sm:$0xf] }
  0x12   : > { %v309_v14 = vld [vmem:[%s1009_s5] sm:$0xf]  ;;  %v857_v25 = vld [vmem:[%s1009_s5 + $0x4] sm:$0xf]  ;;  %v865_v29 = vld [vmem:[%s1009_s5 + $0xc] sm:$0xf] }
  0x13   : > { %853 = vmatmul.msk.f32.vlgmr.msra.gmra.mxu0 %vm282_vm0, %v279_v1  ;;  %v710_v23 = vld [vmem:[%s259_s9] sm:$0xf]  ;;  %v869_v32 = vld [vmem:[%s1009_s5 + $0x10] sm:$0xf]  ;;  %v873_v33 = vld [vmem:[%s1009_s5 + $0x14] sm:$0xf] }
  0x14   : > { %v877_v36 = vld [vmem:[%s1009_s5 + $0x18] sm:$0xf]  ;;  %v881_v37 = vld [vmem:[%s1009_s5 + $0x1c] sm:$0xf]  ;;  %v280_v42 = vld [vmem:[#allocation2] sm:$0xf] }
  0x17   : > { %v336_v3 = vld.sshfl [vmem:[#allocation1] sm:$0xff pattern:$0x75316420] }
  0x18   : > { %389 = vst [vmem:[#allocation1] ss:$2 sm:$0xff] %v387_v2  ;;  %337 = vrot.lane.b32.xlu0 %v336_v3, %s945_s25 }
  0x1f   : > { %v390_v5 = vld.sshfl [vmem:[#allocation1] sm:$0xff pattern:$0x75316420] }
  0x20   : > { %391 = vrot.lane.b32.xlu0 %v390_v5, %s946_s26  ;;  %443 = vst [vmem:[#allocation1] ss:$2 sm:$0xff] %v441_v4 }
  0x27   : > { %v444_v7 = vld.sshfl [vmem:[#allocation1] sm:$0xff pattern:$0x75316420] }
  0x28   : > { %445 = vrot.lane.b32.xlu1 %v444_v7, %s947_s27  ;;  %545 = vst [vmem:[#allocation1] ss:$2 sm:$0xff] %v495_v6  ;;  %713 = vperm.xlu0 %918, %v710_v23  }
  0x2f   : > { %v546_v9 = vld.sshfl [vmem:[#allocation1] sm:$0xff pattern:$0x75316420] }
  0x30   : > { %547 = vrot.lane.b32.xlu1 %v546_v9, %s945_s25  ;;  %599 = vst [vmem:[#allocation1] ss:$2 sm:$0xff] %v597_v8 }
  0x37   : > { %v600_v11 = vld.sshfl [vmem:[#allocation1] sm:$0xff pattern:$0x75316420] }
  0x38   : > { %601 = vrot.lane.b32.xlu2 %v600_v11, %s946_s26  ;;  %653 = vst [vmem:[#allocation1] ss:$2 sm:$0xff] %v651_v10 }
  0x3f   : > { %v654_v12 = vld.sshfl [vmem:[#allocation1] sm:$0xff pattern:$0x75316420] }
  0x40   : > { %655 = vrot.lane.b32.xlu2 %v654_v12, %s947_s27 }
  0x8a   : > { %v338_v13 = vpop.permute.xlu0 %337 }
  0x8b   : > { %855 = vmatpush.xpose.msk.msra.mxu2 %vm282_vm0, %v338_v13 }
  0x8e   : > { %856 = vmatmul.msk.f32.vlgmr.msra.gmra.mxu2 %vm282_vm0, %v279_v1 }
  0x90   : > { %v306_v16 = vpop.f32.mrf.mxu0 }
  0x91   : > { %329 = vmatpush.msra.mxu1 %v306_v16 }
  0x92   : > { %854 = vmatmul.msk.f32.vlgmr.msra.gmra.mxu1 %vm310_vm2, %v309_v14  ;;  %v392_v17 = vpop.permute.xlu0 %391  ;;  %v602_v18 = vpop.permute.xlu2 %601 }
  0x93   : > { %859 = vmatpush.xpose.msk.msrb.mxu1 %vm282_vm0, %v392_v17 }
  0x97   : > { %867 = vmatpush.xpose.msk.msra.mxu1 %vm282_vm0, %v495_v6 }
  0x9a   : > { %v446_v19 = vpop.permute.xlu1 %445  ;;  %860 = vmatmul.msk.f32.vlgmr.msrb.gmra.mxu1 %vm282_vm0, %v279_v1  ;;  %v656_v20 = vpop.permute.xlu2 %655 }
  0x9b   : > { %863 = vmatpush.xpose.msk.msrb.mxu0 %vm282_vm0, %v446_v19  ;;  %875 = vmatpush.xpose.msk.msrb.mxu1 %vm282_vm0, %v602_v18  ;;  %v714_v39 = vpop.permute.xlu0 %713 }
  0x9c   : > { %919 = vrcp.f32 %v714_v39  ;;  %vm721_vm3 = vweird.f32 %v714_v39  ;;  %v727_v55 = vand.u32 2147483648, %v714_v39  ;;  %v725_v56 = vand.u32 2147483647, %v714_v39 }
  0x9e   : > { %864 = vmatmul.msk.f32.vlgmr.msrb.gmra.mxu0 %vm282_vm0, %v279_v1  ;;  %v728_v59 = vor.u32 1.1754944e-38, %v727_v55  ;;  %vm726_vm6 = vcmp.eq.f32.partialorder %v725_v56, 8.507059e+37 }
  0xa2   : > { %v548_v21 = vpop.permute.xlu1 %547  ;;  %868 = vmatmul.msk.f32.vlgmr.msra.gmra.mxu1 %vm282_vm0, %v279_v1  ;;  %v920_v41 = vpop.eup %919 }
  0xa3   : > { %871 = vmatpush.xpose.msk.msra.mxu0 %vm282_vm0, %v548_v21  ;;  %v717_v45 = vmul.f32 %v920_v41, %v714_v39  ;;  %vm722_vm4 = vweird.f32 %v920_v41 }
  0xa4   : > { %vm723_vm5 = vmor %vm721_vm3, %vm722_vm4 }
  0xa5   : > { %v718_v48 = vsub.f32 1.0, %v717_v45 }
  0xa6   : > { %872 = vmatmul.msk.f32.vlgmr.msra.gmra.mxu0 %vm282_vm0, %v279_v1 }
  0xa7   : > { %879 = vmatpush.xpose.msk.msrb.mxu0 %vm282_vm0, %v656_v20  ;;  %v719_v51 = vmul.f32 %v920_v41, %v718_v48 }
  0xa9   : > { %v720_v57 = vadd.f32 %v920_v41, %v719_v51 }
  0xaa   : > { %876 = vmatmul.msk.f32.vlgmr.msrb.gmra.mxu1 %vm282_vm0, %v279_v1 }
  0xab   : > { %v724_v62 = vsel %vm723_vm5, %v920_v41, %v720_v57 }
  0xae   : > { %880 = vmatmul.msk.f32.vlgmr.msrb.gmra.mxu0 %vm282_vm0, %v279_v1  ;;  %v729_v1 = vsel %vm726_vm6, %v728_v59, %v724_v62 }
 0x10f   : > { %v331_v24 = vpop.f32.mrf.mxu1 }
 0x110   : > { %v334_v44 = vadd.f32 %v331_v24, %v280_v42 }
 0x111   : > { %v358_v26 = vpop.f32.mrf.mxu2 }
 0x112   : > { %381 = vmatpush.msra.mxu3 %v358_v26 }
 0x113   : > { %858 = vmatmul.msk.f32.vlgmr.msra.gmra.mxu3 %vm310_vm2, %v857_v25 }
 0x117   : > { %v412_v27 = vpop.f32.mrf.mxu1 }
 0x118   : > { %435 = vmatpush.msrb.mxu3 %v412_v27 }
 0x11b   : > { %862 = vmatmul.msk.f32.vlgmr.msrb.gmra.mxu3 %vm310_vm2, %v861_v28  ;;  %v466_v30 = vpop.f32.mrf.mxu0 }
 0x11c   : > { %489 = vmatpush.msrb.mxu2 %v466_v30 }
 0x11d   : > { %866 = vmatmul.msk.f32.vlgmr.msrb.gmra.mxu2 %vm310_vm2, %v865_v29 }
 0x11f   : > { %v516_v31 = vpop.f32.mrf.mxu1 }
 0x120   : > { %539 = vmatpush.msra.mxu3 %v516_v31 }
 0x123   : > { %870 = vmatmul.msk.f32.vlgmr.msra.gmra.mxu3 %vm310_vm2, %v869_v32  ;;  %v568_v34 = vpop.f32.mrf.mxu0 }
 0x124   : > { %591 = vmatpush.msra.mxu2 %v568_v34 }
 0x125   : > { %874 = vmatmul.msk.f32.vlgmr.msra.gmra.mxu2 %vm310_vm2, %v873_v33 }
 0x127   : > { %v622_v35 = vpop.f32.mrf.mxu1 }
 0x128   : > { %645 = vmatpush.msrb.mxu3 %v622_v35 }
 0x12b   : > { %878 = vmatmul.msk.f32.vlgmr.msrb.gmra.mxu3 %vm310_vm2, %v877_v36  ;;  %v676_v38 = vpop.f32.mrf.mxu0 }
 0x12c   : > { %699 = vmatpush.msrb.mxu2 %v676_v38 }
 0x12d   : > { %882 = vmatmul.msk.f32.vlgmr.msrb.gmra.mxu2 %vm310_vm2, %v881_v37 }
 0x196   : > { %v383_v40 = vpop.f32.mrf.mxu3 }
 0x197   : > { %v386_v47 = vadd.f32 %v383_v40, %v334_v44 }
 0x19e   : > { %v437_v43 = vpop.f32.mrf.mxu3 }
 0x19f   : > { %v440_v49 = vadd.f32 %v437_v43, %v386_v47 }
 0x1a0   : > { %v491_v46 = vpop.f32.mrf.mxu2 }
 0x1a1   : > { %v494_v52 = vadd.f32 %v491_v46, %v440_v49 }
 0x1a6   : > { %v541_v50 = vpop.f32.mrf.mxu3 }
 0x1a7   : > { %v544_v54 = vadd.f32 %v541_v50, %v494_v52 }
 0x1a8   : > { %v593_v53 = vpop.f32.mrf.mxu2 }
 0x1a9   : > { %v596_v58 = vadd.f32 %v593_v53, %v544_v54 }
 0x1ae   : > { %v647_v60 = vpop.f32.mrf.mxu3 }
 0x1af   : > { %v650_v61 = vadd.f32 %v647_v60, %v596_v58 }
 0x1b0   : > { %v701_v63 = vpop.f32.mrf.mxu2 }
 0x1b1   : > { %v704_v0 = vadd.f32 %v701_v63, %v650_v61 }
 0x1b3   : > { %706 = vst.msk [vmem:[#allocation2] sm:$0xf] %vm277_vm1, %v704_v0  ;;  %v730_v2 = vmul.f32 %v729_v1, %v704_v0 }
 0x1b5   : > { %v731_v3 = vperm.slane %v730_v2, 3 }
 0x1b7   : > { %v732_v4 = vsub.f32 %v730_v2, %v731_v3 }
 0x1b9   : > { %v733_v5 = vmul.f32 %v732_v4, %v732_v4 }
 0x1bb   : > { %v735_v6 = vsel %vm734_vm7, %v733_v5, 0.0 }
 0x1bc   : > { %736 = vadd.xlane.f32.xlu1 %v735_v6 }
 0x22f   : > { %v737_v7 = vpop.xlane.xlu1 %736 }
 0x230   : > { %v738_v8 = vrot.slane %v737_v7, 4 }
 0x232   : > { %v739_v9 = vadd.f32 %v738_v8, %v737_v7 }
 0x234   : > { %v740_v10 = vrot.slane %v739_v9, 2 }
 0x236   : > { %v741_v11 = vadd.f32 %v740_v10, %v739_v9 }
 0x238   : > { %v742_v12 = vrot.slane %v741_v11, 1 }
 0x23a   : > { %v743_v13 = vadd.f32 %v742_v12, %v741_v11 }
 0x23c   : > { %887 = vpush %v743_v13 }
 0x26d   : > { %s888_s13 = spop %887 }
 0x26e   : > { %v745_v14 = vstv %s888_s13 }
 0x26f   : > { %747 = vst.msk [vmem:[%s272_s12] sm:$0x1] %vm746_vm8, %v745_v14 }
 0x270 PF: > { %s14_s17 = sadd.s32 1, %s943_s17   ;;  %s1064_s15 = smov %s939_s16 }
 0x271   : > { %p11_p5 = scmp.ge.s32.totalorder %s14_s17, 4   ;;  %s1065_s16 = smov %s1067_s18 }
 0x273   :  { %13 = sbr.rel (!%p11_p5) target bundleno = 2 (0x2), region = 87 }

</bundles_post_ra>
